<compile_context>
chip_gen: v6e
topology: v6e:2x2x1
jax: 0.10.0
libtpu: 0.0.40
codegen_flags: <defaults>
</compile_context>

<pallas_src>
from functools import partial

import jax
import jax.numpy as jnp
from jax import lax
from jax.experimental import pallas as pl
from jax.experimental.pallas import tpu as pltpu


def attention_kernel(x_ref, wqkv_t_ref, bqkv_ref, wproj_ref, bproj_ref, o_ref,
                     *, H, Dh):
    """One grid step == one sample's full attention.

    x_ref      : [N, D]    this sample's tokens (lane-dense on D)
    wqkv_t_ref : [3D, D]   fused QKV weight, rows = output features
                           (rows 0:D are Q and are pre-scaled by 1/sqrt(Dh))
    bqkv_ref   : [3D, 1]   matching bias column (Q rows pre-scaled)
    wproj_ref  : [D, D]    output projection, [in_features, out_features]
    bproj_ref  : [1, D]
    o_ref      : [N, D]
    """
    N, D = x_ref.shape
    x = x_ref[...]                                                   # [N, D]

    # ---- Fused QKV projection: ONE matmul, K = D contraction depth. ----
    # Feature-major output so per-(part, head) splits are sublane re-tiling.
    qkv_t = lax.dot_general(
        wqkv_t_ref[...], x, (((1,), (1,)), ((), ())),                # trans_b
        preferred_element_type=jnp.float32) + bqkv_ref[...]          # [3D, N]
    qkv_t = qkv_t.reshape(3, H, Dh, N)                               # free split
    q = qkv_t[0]                                                     # [H, Dh, N] (pre-scaled)
    k = qkv_t[1]                                                     # [H, Dh, N]
    v = qkv_t[2]                                                     # [H, Dh, N]

    # ---- Scores, batched over heads: one lowered op. ----
    # s[h, i, j] = sum_d q[h, d, i] * k[h, d, j]   (scale already folded in q)
    s = lax.dot_general(q, k, (((1,), (1,)), ((0,), (0,))),
                        preferred_element_type=jnp.float32)          # [H, N, N]

    # Numerically-stable softmax; EUP reciprocal instead of a VALU divide.
    s = s - jnp.max(s, axis=-1, keepdims=True)
    p = jnp.exp(s)
    attn = p * pl.reciprocal(jnp.sum(p, axis=-1, keepdims=True), approx=True)

    # ---- Weighted average of values, batched over heads (A @ B^T form). ----
    # ctx_t[h, d, i] = sum_j v[h, d, j] * attn[h, i, j]
    ctx_t = lax.dot_general(v, attn, (((2,), (2,)), ((0,), (0,))),
                            preferred_element_type=jnp.float32)      # [H, Dh, N]

    # ---- Output projection: ONE matmul contracting jointly over (H, Dh). ----
    # Merging the leading (H, Dh) dims is free (Dh == sublane group); the
    # contraction then uses the full K = D depth in a single MXU pass — no
    # per-head partial products and no H-way reduction.
    ctx_flat = ctx_t.reshape(H * Dh, N)                              # [D, N]
    out = lax.dot_general(ctx_flat, wproj_ref[...],
                          (((0,), (0,)), ((), ())),                  # trans_a
                          preferred_element_type=jnp.float32)        # [N, D]

    # Single store for the whole output block.
    o_ref[...] = (out + bproj_ref[...]).astype(o_ref.dtype)


def prepare_attention_params(w_qkv, b_qkv, w_proj, b_proj, num_heads):
    """One-time weight re-layout, hoisted out of the per-call forward path.

    w_qkv: [D, 3D] (in_features, out_features); b_qkv: [3D];
    w_proj: [D, D]; b_proj: [D].
    """
    D = w_proj.shape[0]
    Dh = D // num_heads
    scale = jnp.asarray(Dh, jnp.float32) ** -0.5

    w_qkv_t = w_qkv.T                                   # [3D, D], rows = out features
    b_qkv_c = b_qkv.reshape(3 * D, 1)
    # Fold the 1/sqrt(Dh) attention scale into the Q rows (exact).
    row_scale = jnp.where(jnp.arange(3 * D) < D, scale,
                          jnp.float32(1.0)).astype(w_qkv.dtype)
    w_qkv_t = w_qkv_t * row_scale[:, None]
    b_qkv_c = b_qkv_c * row_scale[:, None]
    return w_qkv_t, b_qkv_c, w_proj, b_proj.reshape(1, D)


@partial(jax.jit, static_argnames=("num_heads",))
def attention_pallas(x, w_qkv_t, b_qkv_c, w_proj, b_proj_r, num_heads):
    """x: [B, N, D]; weights pre-permuted by prepare_attention_params."""
    B, N, D = x.shape
    H = num_heads
    assert D % H == 0
    Dh = D // H
    T = B * N

    x2 = x.reshape(T, D)                                # free reshape
    kernel = partial(attention_kernel, H=H, Dh=Dh)

    out = pl.pallas_call(
        kernel,
        out_shape=jax.ShapeDtypeStruct((T, D), x.dtype),
        grid=(B,),                                      # one sample per step
        in_specs=[
            pl.BlockSpec((N, D), lambda b: (b, 0)),         # x tokens of sample b
            pl.BlockSpec((3 * D, D), lambda b: (0, 0)),     # qkv weight (resident)
            pl.BlockSpec((3 * D, 1), lambda b: (0, 0)),     # qkv bias
            pl.BlockSpec((D, D), lambda b: (0, 0)),         # proj weight
            pl.BlockSpec((1, D), lambda b: (0, 0)),         # proj bias
        ],
        out_specs=pl.BlockSpec((N, D), lambda b: (b, 0)),
        compiler_params=pltpu.CompilerParams(
            dimension_semantics=("parallel",)),         # both TCs on v7x
    )(x2, w_qkv_t, b_qkv_c, w_proj, b_proj_r)
    return out.reshape(B, N, D)


def attention_ref(x, w_qkv, b_qkv, w_proj, b_proj, num_heads):
    """Pure-JAX reference mirroring the PyTorch forward exactly."""
    B, N, D = x.shape
    Dh = D // num_heads
    qkv = x @ w_qkv + b_qkv
    qkv = qkv.reshape(B, N, 3, num_heads, Dh).transpose(2, 0, 3, 1, 4)
    q, k, v = qkv[0], qkv[1], qkv[2]
    dp = jnp.einsum('bhnd,bhmd->bhnm', q, k) * (Dh ** -0.5)
    attn = jax.nn.softmax(dp, axis=-1)
    ctx = jnp.einsum('bhnm,bhmd->bhnd', attn, v)
    ctx = ctx.transpose(0, 2, 1, 3).reshape(B, N, D)
    return ctx @ w_proj + b_proj


if __name__ == "__main__":
    # Small shapes consistent with the module: embed dim divisible by 6 heads.
    B, N, D, H = 2, 8, 48, 6

    key = jax.random.PRNGKey(0)
    kx, k1, k2, k3, k4 = jax.random.split(key, 5)

    x = jax.random.normal(kx, (B, N, D), dtype=jnp.float32)
    # Synthetic parameters, stored [in_features, out_features] (transposed vs.
    # torch nn.Linear.weight) so the math is plain x @ W + b.
    w_qkv = jax.random.normal(k1, (D, 3 * D), dtype=jnp.float32) * (D ** -0.5)
    b_qkv = jax.random.normal(k2, (3 * D,), dtype=jnp.float32) * 0.02
    w_proj = jax.random.normal(k3, (D, D), dtype=jnp.float32) * (D ** -0.5)
    b_proj = jax.random.normal(k4, (D,), dtype=jnp.float32) * 0.02

    # One-time re-layout (NOT in the per-call path).
    params = prepare_attention_params(w_qkv, b_qkv, w_proj, b_proj, num_heads=H)

    out = attention_pallas(x, *params, num_heads=H)
    out = jax.block_until_ready(out)

    ref = attention_ref(x, w_qkv, b_qkv, w_proj, b_proj, num_heads=H)
    assert out.shape == (B, N, D)
    # Tolerance accounts for the intentionally-approximate EUP reciprocal used
    # in the softmax normalization (otherwise the kernel is exact f32).
    err = float(jnp.max(jnp.abs(out - ref)))
    assert jnp.allclose(out, ref, atol=5e-3, rtol=5e-3), \
        f"mismatch vs reference (max abs err {err})"

    print("KERNEL_OK")
</pallas_src>

<mosaic_0001>
module attributes {stable_mosaic.version = 11 : i64} {
  func.func @attention_kernel(%arg0: i32, %arg1: memref<8x48xf32, #tpu.memory_space<vmem>>, %arg2: memref<144x48xf32, #tpu.memory_space<vmem>>, %arg3: memref<144x1xf32, #tpu.memory_space<vmem>>, %arg4: memref<48x48xf32, #tpu.memory_space<vmem>>, %arg5: memref<1x48xf32, #tpu.memory_space<vmem>>, %arg6: memref<8x48xf32, #tpu.memory_space<vmem>>) attributes {dimension_semantics = [#tpu.dimension_semantics<parallel>], iteration_bounds = array<i64: 2>, scalar_prefetch = 0 : i64, scratch_operands = 0 : i64, tpu.core_type = #tpu.core_type<tc>, window_params = [{transform_indices = @transform_0, window_bounds = array<i64: 8, 48>}, {pipeline_mode = #tpu.pipeline_mode<synchronous>, transform_indices = @transform_1, window_bounds = array<i64: 144, 48>}, {pipeline_mode = #tpu.pipeline_mode<synchronous>, transform_indices = @transform_2, window_bounds = array<i64: 144, 1>}, {pipeline_mode = #tpu.pipeline_mode<synchronous>, transform_indices = @transform_3, window_bounds = array<i64: 48, 48>}, {pipeline_mode = #tpu.pipeline_mode<synchronous>, transform_indices = @transform_4, window_bounds = array<i64: 1, 48>}, {transform_indices = @transform_5, window_bounds = array<i64: 8, 48>}]} {
    %c0 = arith.constant 0 : index
    %c0_0 = arith.constant 0 : index
    %0 = vector.load %arg1[%c0, %c0_0] : memref<8x48xf32, #tpu.memory_space<vmem>>, vector<8x48xf32>
    %c0_1 = arith.constant 0 : index
    %c0_2 = arith.constant 0 : index
    %1 = vector.load %arg2[%c0_1, %c0_2] : memref<144x48xf32, #tpu.memory_space<vmem>>, vector<144x48xf32>
    %cst = arith.constant dense<0.000000e+00> : vector<144x8xf32>
    %2 = tpu.matmul %1, %0, %cst {dimension_numbers = #tpu.dot_dimension_numbers<[1], [1], [0], [0], [0, 0, 1, 0], [], []>} : vector<144x48xf32>, vector<8x48xf32>, vector<144x8xf32> -> vector<144x8xf32>
    %c0_3 = arith.constant 0 : index
    %c0_4 = arith.constant 0 : index
    %3 = vector.load %arg3[%c0_3, %c0_4] : memref<144x1xf32, #tpu.memory_space<vmem>>, vector<144x1xf32>
    %4 = vector.broadcast %3 : vector<144x1xf32> to vector<144x8xf32>
    %5 = arith.addf %2, %4 : vector<144x8xf32>
    %6 = vector.shape_cast %5 : vector<144x8xf32> to vector<3x6x8x8xf32>
    %7 = vector.extract_strided_slice %6 {offsets = [0, 0, 0, 0], sizes = [1, 6, 8, 8], strides = [1, 1, 1, 1]} : vector<3x6x8x8xf32> to vector<1x6x8x8xf32>
    %8 = vector.shape_cast %7 : vector<1x6x8x8xf32> to vector<6x8x8xf32>
    %9 = vector.extract_strided_slice %6 {offsets = [1, 0, 0, 0], sizes = [1, 6, 8, 8], strides = [1, 1, 1, 1]} : vector<3x6x8x8xf32> to vector<1x6x8x8xf32>
    %10 = vector.shape_cast %9 : vector<1x6x8x8xf32> to vector<6x8x8xf32>
    %11 = vector.extract_strided_slice %6 {offsets = [2, 0, 0, 0], sizes = [1, 6, 8, 8], strides = [1, 1, 1, 1]} : vector<3x6x8x8xf32> to vector<1x6x8x8xf32>
    %12 = vector.shape_cast %11 : vector<1x6x8x8xf32> to vector<6x8x8xf32>
    %cst_5 = arith.constant dense<0.000000e+00> : vector<6x8x8xf32>
    %13 = tpu.matmul %8, %10, %cst_5 {dimension_numbers = #tpu.dot_dimension_numbers<[1], [1], [2], [2], [0, 0, 0, 2, 1, 2], [0], [0]>} : vector<6x8x8xf32>, vector<6x8x8xf32>, vector<6x8x8xf32> -> vector<6x8x8xf32>
    %cst_6 = arith.constant dense<0xFF800000> : vector<6x8xf32>
    %14 = vector.multi_reduction <maximumf>, %13, %cst_6 [2] : vector<6x8x8xf32> to vector<6x8xf32>
    %15 = vector.shape_cast %14 : vector<6x8xf32> to vector<6x8x1xf32>
    %16 = vector.broadcast %15 : vector<6x8x1xf32> to vector<6x8x8xf32>
    %17 = arith.subf %13, %16 : vector<6x8x8xf32>
    %18 = math.exp %17 : vector<6x8x8xf32>
    %cst_7 = arith.constant dense<0.000000e+00> : vector<6x8xf32>
    %19 = vector.multi_reduction <add>, %18, %cst_7 [2] : vector<6x8x8xf32> to vector<6x8xf32>
    %20 = vector.shape_cast %19 : vector<6x8xf32> to vector<6x8x1xf32>
    %21 = tpu.reciprocal %20 {approx = true} : vector<6x8x1xf32> -> vector<6x8x1xf32>
    %22 = vector.broadcast %21 : vector<6x8x1xf32> to vector<6x8x8xf32>
    %23 = arith.mulf %18, %22 : vector<6x8x8xf32>
    %cst_8 = arith.constant dense<0.000000e+00> : vector<6x8x8xf32>
    %24 = tpu.matmul %12, %23, %cst_8 {dimension_numbers = #tpu.dot_dimension_numbers<[2], [2], [1], [1], [0, 0, 0, 1, 1, 1], [0], [0]>} : vector<6x8x8xf32>, vector<6x8x8xf32>, vector<6x8x8xf32> -> vector<6x8x8xf32>
    %25 = vector.shape_cast %24 : vector<6x8x8xf32> to vector<48x8xf32>
    %c0_9 = arith.constant 0 : index
    %c0_10 = arith.constant 0 : index
    %26 = vector.load %arg4[%c0_9, %c0_10] : memref<48x48xf32, #tpu.memory_space<vmem>>, vector<48x48xf32>
    %cst_11 = arith.constant dense<0.000000e+00> : vector<8x48xf32>
    %27 = tpu.matmul %25, %26, %cst_11 {dimension_numbers = #tpu.dot_dimension_numbers<[0], [0], [1], [1], [0, 1, 1, 1], [], []>} : vector<48x8xf32>, vector<48x48xf32>, vector<8x48xf32> -> vector<8x48xf32>
    %c0_12 = arith.constant 0 : index
    %c0_13 = arith.constant 0 : index
    %28 = vector.load %arg5[%c0_12, %c0_13] : memref<1x48xf32, #tpu.memory_space<vmem>>, vector<1x48xf32>
    %29 = vector.broadcast %28 : vector<1x48xf32> to vector<8x48xf32>
    %30 = arith.addf %27, %29 : vector<8x48xf32>
    %c0_14 = arith.constant 0 : index
    %c0_15 = arith.constant 0 : index
    %31 = vector.load %arg6[%c0_14, %c0_15] : memref<8x48xf32, #tpu.memory_space<vmem>>, vector<8x48xf32>
    tpu.vector_store %arg6[%c0_14, %c0_15], %30 {strides = array<i32>} : memref<8x48xf32, #tpu.memory_space<vmem>>, vector<8x48xf32>,
    return
  }
  func.func @transform_0(%arg0: i32) -> (i32, i32) {
    %c0_i32 = arith.constant 0 : i32
    %c0_i32_0 = arith.constant 0 : i32
    return %arg0, %c0_i32 : i32, i32
  }
  func.func @transform_1(%arg0: i32) -> (i32, i32) {
    %c0_i32 = arith.constant 0 : i32
    %c0_i32_0 = arith.constant 0 : i32
    %c0_i32_1 = arith.constant 0 : i32
    return %c0_i32, %c0_i32_0 : i32, i32
  }
  func.func @transform_2(%arg0: i32) -> (i32, i32) {
    %c0_i32 = arith.constant 0 : i32
    %c0_i32_0 = arith.constant 0 : i32
    %c0_i32_1 = arith.constant 0 : i32
    return %c0_i32, %c0_i32_0 : i32, i32
  }
  func.func @transform_3(%arg0: i32) -> (i32, i32) {
    %c0_i32 = arith.constant 0 : i32
    %c0_i32_0 = arith.constant 0 : i32
    %c0_i32_1 = arith.constant 0 : i32
    return %c0_i32, %c0_i32_0 : i32, i32
  }
  func.func @transform_4(%arg0: i32) -> (i32, i32) {
    %c0_i32 = arith.constant 0 : i32
    %c0_i32_0 = arith.constant 0 : i32
    %c0_i32_1 = arith.constant 0 : i32
    return %c0_i32, %c0_i32_0 : i32, i32
  }
  func.func @transform_5(%arg0: i32) -> (i32, i32) {
    %c0_i32 = arith.constant 0 : i32
    %c0_i32_0 = arith.constant 0 : i32
    return %arg0, %c0_i32 : i32, i32
  }
}

</mosaic_0001>

<bundles_post_ra>
// kernel: attention_pallas.1
= control target key start
LH: loop header
LB: loop body
LE: loop exit
PB: predicated region body
PF: predicated region fallthrough
CT: control target
= control target key end

     0   :  { %10 = vsyncpa [#allocation3], 0  ;;  %s2594_s0 = inlined_call_operand.vmem [shape: f32[16,48], index: 0, kind: input, shape index: {}]   ;;  %s2595_s1 = inlined_call_operand.vmem [shape: f32[144,48], index: 1, kind: input, shape index: {}]   ;;  %s2596_s2 = inlined_call_operand.vmem [shape: f32[144,1], index: 2, kind: input, shape index: {}]   ;;  %s2597_s3 = inlined_call_operand.vmem [shape: f32[48,48], index: 3, kind: input, shape index: {}]   ;;  %s2598_s4 = inlined_call_operand.vmem [shape: f32[1,48], index: 4, kind: input, shape index: {}]   ;;  %s2599_s5 = inlined_call_operand.hbm [shape: f32[16,48], index: 5, kind: output, shape index: {}]  }
   0x1   :  { %12 = vsyncpa [#allocation3 + $0x1], 0  ;;  %s2272_s18 = smov 0   ;;  %s2274_s19 = smov 0  }
   0x2   :  { %s2276_s20 = smov 0   ;;  %s2278_s21 = smov 0  }
   0x3 LB: > { %s2293_s22 = sadd.s32 4294967295, %s2236_s21   ;;  %s1905_s23 = sadd.s32 4294967294, %s2236_s21   ;;  %s2236_s21 = sphi %s2278_s21, %s2605_s21   ;;  %s2232_s20 = sphi %s2276_s20, %s2604_s20   ;;  %s2228_s19 = sphi %s2274_s19, %s2603_s19   ;;  %s2224_s18 = sphi %s2272_s18, %s2602_s18  }
   0x4   : > { %s2297_s24 = sadd.s32 1, %s2236_s21   ;;  %s135_s25 = sadd.s32 1, %s2232_s20 }
   0x5   : > { %s132_s26 = ssub.s32 %s2236_s21, %s2297_s24  ;;  %p145_p0 = scmp.ne.s32.totalorder %s2232_s20, %s2228_s19 }
   0x6   : > { %p133_p1 = scmp.eq.s32.totalorder %s132_s26, 0  ;;  %p146_p2 = scmp.eq.s32.totalorder %s2293_s22, 1 }
   0x7   : > { %p151_p3 = scmp.ne.s32.totalorder %s2228_s19, %s2224_s18  ;;  %p152_p4 = scmp.eq.s32.totalorder %s1905_s23, 1 }
   0x8   : > { %s2308_s27 = scalar_select %p133_p1, %s2232_s20, %s135_s25  }
   0x9   : > { %p2310_p5 = por %p146_p2, %p145_p0  ;;  %p2314_p6 = por %p152_p4, %p151_p3 }
   0xa   : > { %p1908_p7 = scmp.ge.s32.totalorder %s2236_s21, 1  ;;  %p189_p8 = scmp.lt.s32.totalorder %s2236_s21, 3 }
   0xc   : > { %p190_p9 = pnand %p1908_p7, %p189_p8 }
   0xd   : > { %p216_p10 = scmp.lt.s32.totalorder (!%p190_p9), %s2293_s22, 1  ;;  %s213_s14 = sand.u32 (!%p190_p9), 1, %s2228_s19  }
   0xe   : > { %193 = sbr.rel (%p190_p9) target bundleno = 1384 (0x568), region = 40  ;;  %s1951_s23 = sshll.u32 (!%p190_p9), %s2293_s22, 7 }
  0x13   : > { %vm347_vm0 = vcmask 392192   ;;  %v221_v0 = vld [vmem:[%s2595_s1] sm:$0xff]  ;;  %v2238_v1 = vmov 0   ;;  %s217_s7 = scalar_select %p216_p10, %s2293_s22, 1  ;;  %v241_v3 = vld [vmem:[%s2596_s2 + $0x10] sm:$0xff]  ;;  %v240_v5 = vld [vmem:[%s2596_s2 + $0x8] sm:$0xff] }
  0x14   : > { %2006 = vmatprep.mubr.msk.f32.mxu0 %vm347_vm0, %v221_v0  ;;  %2150 = vset.pattern.permute.xlu0 %v2238_v1  ;;  %v239_v2 = vld [vmem:[%s2596_s2] sm:$0xff]  ;;  %v242_v6 = vld [vmem:[%s2596_s2 + $0x18] sm:$0xff]  ;;  %v222_v7 = vld [vmem:[%s2595_s1 + $0x8] sm:$0xff]  ;;  %v2239_v26 = vmov 0.0   ;;  %vm2240_vm1 = vmmov 0   ;;  %vm592_vm2 = vcmask 64512  }
  0x15   : > { %2151 = vset.pattern.permute.xlu1 %v2238_v1  ;;  %s1910_s8 = sshll.u32 %s217_s7, 3  ;;  %259 = vperm.xlu0 %2150, %v239_v2   ;;  %v223_v8 = vld [vmem:[%s2595_s1 + $0x10] sm:$0xff]  ;;  %v243_v9 = vld [vmem:[%s2596_s2 + $0x20] sm:$0xff]  ;;  %v244_v10 = vld [vmem:[%s2596_s2 + $0x28] sm:$0xff]  ;;  %s2558_s7 = scalar_lea.hbm %s2599_s5, %s1951_s23 }
  0x16   : > { %s219_s15 = scalar_lea.vmem %s2594_s0, %s1910_s8  ;;  %269 = vperm.xlu1 %2151, %v241_v3   ;;  %v224_v11 = vld [vmem:[%s2595_s1 + $0x18] sm:$0xff]  ;;  %v225_v12 = vld [vmem:[%s2595_s1 + $0x20] sm:$0xff]  ;;  %v245_v13 = vld [vmem:[%s2596_s2 + $0x30] sm:$0xff]  ;;  %2033 = vmatprep.subr.mxu1 %v2239_v26  ;;  %s1833_s8 = scalar_lea.sflag [#allocation3], %s213_s14 }
  0x17   : > { %v220_v4 = vld [vmem:[%s219_s15] sm:$0xff]  ;;  %v246_v14 = vld [vmem:[%s2596_s2 + $0x38] sm:$0xff]  ;;  %v226_v15 = vld [vmem:[%s2595_s1 + $0x28] sm:$0xff]  ;;  %2035 = vmatprep.mubr.msk.f32.mxu1 %vm2240_vm1, %v2239_v26  ;;  %s1909_s15 = sshll.u32 %s213_s14, 3  ;;  %s2241_s22 = smov [#allocation2]  }
  0x18   : > { %2004 = vmatprep.subr.msk.mxu0 %vm347_vm0, %v220_v4  ;;  %v227_v16 = vld [vmem:[%s2595_s1 + $0x30] sm:$0xff]  ;;  %v247_v17 = vld [vmem:[%s2596_s2 + $0x40] sm:$0xff]  ;;  %v248_v18 = vld [vmem:[%s2596_s2 + $0x48] sm:$0xff]  ;;  %s215_s25 = scalar_lea.vmem [#allocation2], %s1909_s15  ;;  %s2180_s10 = sshll.u32 %s2241_s22, 4  ;;  %s2181_s10 = int_to_ptr.vmem [resolvable:$false] %s2180_s10 }
  0x19   : > { %2005 = vmatpush3.xpose.msk.msra.mxu0 %vm347_vm0, %v220_v4  ;;  %264 = vperm.xlu0 %2150, %v240_v5   ;;  %v228_v19 = vld [vmem:[%s2595_s1 + $0x38] sm:$0xff]  ;;  %v229_v20 = vld [vmem:[%s2595_s1 + $0x40] sm:$0xff]  ;;  %v249_v21 = vld [vmem:[%s2596_s2 + $0x50] sm:$0xff]  ;;  %s1846_s26 = sshll.u32 %s215_s25, 4  ;;  %s2182_s11 = scalar_lea.vmem %s2181_s10, 256  ;;  %s1847_s26 = int_to_ptr.vmem [resolvable:$true] %s1846_s26 }
  0x1a   : > { %274 = vperm.xlu1 %2151, %v242_v6   ;;  %v250_v22 = vld [vmem:[%s2596_s2 + $0x58] sm:$0xff]  ;;  %v230_v23 = vld [vmem:[%s2595_s1 + $0x48] sm:$0xff]  ;;  %v231_v24 = vld [vmem:[%s2595_s1 + $0x50] sm:$0xff]  ;;  %2093 = vmatprep.subr.mxu0 %v2239_v26  ;;  %s2176_s9 = scalar_lea.vmem %s1847_s26, 128  ;;  %p2183_p0 = scmp.lt.s32.totalorder %s1847_s26, %s2181_s10 }
  0x1b   : > { %v232_v25 = vld [vmem:[%s2595_s1 + $0x58] sm:$0xff]  ;;  %v233_v49 = vld [vmem:[%s2595_s1 + $0x60] sm:$0xff]  ;;  %v234_v50 = vld [vmem:[%s2595_s1 + $0x68] sm:$0xff]  ;;  %p2177_p11 = scmp.ne.s32.totalorder %s1847_s26, %s2176_s9  ;;  %p2184_p1 = scmp.lt.s32.totalorder %s2182_s11, %s2176_s9 }
  0x1c   : > { %2007 = vmatmul.mubr.msk.f32.vlgmr.msra.gmra.mxu0 %vm347_vm0, %v222_v7  ;;  %v235_v51 = vld [vmem:[%s2595_s1 + $0x70] sm:$0xff]  ;;  %v236_v52 = vld [vmem:[%s2595_s1 + $0x78] sm:$0xff] }
  0x1d   : > { %2009 = vmatprep.mubr.msk.f32.mxu0 %vm347_vm0, %v223_v8  ;;  %279 = vperm.xlu0 %2150, %v243_v9   ;;  %v237_v9 = vld [vmem:[%s2595_s1 + $0x80] sm:$0xff]  ;;  %p2178_p12 = pnand %p2177_p11, %p2310_p5  ;;  %p2185_p2 = por %p2184_p1, %p2183_p0 }
  0x1e   : > { %284 = vperm.xlu1 %2151, %v244_v10   ;;  %v238_v10 = vld [vmem:[%s2595_s1 + $0x88] sm:$0xff] }
  0x1f   : > { %p2179_p13 = pneg %p2178_p12 }
  0x20   : > { %2010 = vmatmul.mubr.msk.f32.gmra.mxu0 %vm347_vm0, %v224_v11 }
  0x21   : > { %2012 = vmatprep.mubr.msk.f32.mxu0 %vm347_vm0, %v225_v12  ;;  %289 = vperm.xlu0 %2150, %v245_v13   ;;  %p2186_p3 = pnand %p2185_p2, %p2179_p13 }
  0x22   : > { %294 = vperm.xlu1 %2151, %v246_v14  }
  0x24   : > { %2013 = vmatmul.mubr.msk.f32.gmra.mxu0 %vm347_vm0, %v226_v15 }
  0x25   : > { %2015 = vmatprep.mubr.msk.f32.mxu0 %vm347_vm0, %v227_v16  ;;  %299 = vperm.xlu0 %2150, %v247_v17  }
  0x26   : > { %304 = vperm.xlu1 %2151, %v248_v18  }
  0x28   : > { %2016 = vmatmul.mubr.msk.f32.gmra.mxu0 %vm347_vm0, %v228_v19 }
  0x29   : > { %2018 = vmatprep.mubr.msk.f32.mxu0 %vm347_vm0, %v229_v20  ;;  %309 = vperm.xlu0 %2150, %v249_v21  }
  0x2a   : > { %314 = vperm.xlu1 %2151, %v250_v22  }
  0x2c   : > { %2019 = vmatmul.mubr.msk.f32.gmra.mxu0 %vm347_vm0, %v230_v23 }
  0x2d   : > { %2021 = vmatprep.mubr.msk.f32.mxu0 %vm347_vm0, %v231_v24 }
  0x30   : > { %2022 = vmatmul.mubr.msk.f32.gmra.mxu0 %vm347_vm0, %v232_v25 }
  0x31   : > { %2024 = vmatprep.mubr.msk.f32.mxu0 %vm347_vm0, %v233_v49 }
  0x34   : > { %2025 = vmatmul.mubr.msk.f32.gmra.mxu0 %vm347_vm0, %v234_v50 }
  0x35   : > { %2027 = vmatprep.mubr.msk.f32.mxu0 %vm347_vm0, %v235_v51 }
  0x38   : > { %2028 = vmatmul.mubr.msk.f32.gmra.mxu0 %vm347_vm0, %v236_v52 }
  0x39   : > { %2030 = vmatprep.mubr.msk.f32.mxu0 %vm347_vm0, %v237_v9 }
  0x3c   : > { %2031 = vmatmul.mubr.msk.f32.gmra.mxu0 %vm347_vm0, %v238_v10 }
  0x3d   : > { %2105 = vmatprep.mubr.msk.f32.mxu0 %vm2240_vm1, %v2239_v26 }
  0x90   : > { %v260_v27 = vpop.permute.xlu0 %259 }
  0x91   : > { %v270_v28 = vpop.permute.xlu1 %269 }
  0x94   : > { %v265_v29 = vpop.permute.xlu0 %264 }
  0x95   : > { %v275_v32 = vpop.permute.xlu1 %274 }
  0x98   : > { %v280_v37 = vpop.permute.xlu0 %279 }
  0x99   : > { %v285_v39 = vpop.permute.xlu1 %284 }
  0x9c   : > { %v290_v45 = vpop.permute.xlu0 %289 }
  0x9d   : > { %v295_v53 = vpop.permute.xlu1 %294 }
  0xa0   : > { %v300_v54 = vpop.permute.xlu0 %299 }
  0xa1   : > { %v305_v55 = vpop.permute.xlu1 %304 }
  0xa4   : > { %v310_v56 = vpop.permute.xlu0 %309 }
  0xa5   : > { %v315_v58 = vpop.permute.xlu1 %314 }
  0xdc   : > { %v2008_v30 = vpop.f32.mrf.mxu0 }
  0xdd   : > { %v477_v31 = vadd.f32 %v2008_v30, %v265_v29  ;;  %v251_v30 = vld [vmem:[%s2596_s2 + $0x60] sm:$0xff] }
  0xde   : > { %v471_v33 = vpop.f32.mrf.mxu0 }
  0xdf   : > { %v472_v34 = vadd.f32 %v471_v33, %v260_v27  ;;  %666 = vxpose.xlu1.b32.start.end [1/1] (short) (narrow) %v477_v31, 8  ;;  %v253_v31 = vld [vmem:[%s2596_s2 + $0x70] sm:$0xff]  ;;  %v252_v33 = vld [vmem:[%s2596_s2 + $0x68] sm:$0xff] }
  0xe0   : > { %v2011_v35 = vpop.f32.mrf.mxu0 }
  0xe1   : > { %560 = vxpose.xlu0.b32.start.end [1/1] (short) (narrow) %v472_v34, 8  ;;  %v487_v43 = vadd.f32 %v2011_v35, %v275_v32  ;;  %v254_v32 = vld [vmem:[%s2596_s2 + $0x78] sm:$0xff] }
  0xe2   : > { %v481_v36 = vpop.f32.mrf.mxu0 }
  0xe3   : > { %v482_v38 = vadd.f32 %v481_v36, %v270_v28 }
  0xe4   : > { %v2014_v40 = vpop.f32.mrf.mxu0 }
  0xe5   : > { %v497_v41 = vadd.f32 %v2014_v40, %v285_v39  ;;  %771 = vxpose.xlu0.b32.start.end [1/1] (short) (narrow) %v482_v38, 8 }
  0xe6   : > { %v491_v42 = vpop.f32.mrf.mxu0 }
  0xe7   : > { %1086 = vxpose.xlu1.b32.start.end [1/1] (short) (narrow) %v497_v41, 8  ;;  %v492_v47 = vadd.f32 %v491_v42, %v280_v37 }
  0xe8   : > { %v2017_v44 = vpop.f32.mrf.mxu0 }
  0xe9   : > { %876 = vxpose.xlu0.b32.start.end [1/1] (short) (narrow) %v487_v43, 8  ;;  %v507_v59 = vadd.f32 %v2017_v44, %v295_v53 }
  0xea   : > { %v501_v46 = vpop.f32.mrf.mxu0 }
  0xeb   : > { %v502_v48 = vadd.f32 %v501_v46, %v290_v45 }
  0xec   : > { %v2020_v57 = vpop.f32.mrf.mxu0 }
  0xed   : > { %2034 = vmatpush3.msra.mxu1 %v502_v48  ;;  %981 = vxpose.xlu0.b32.start.end [1/1] (short) (narrow) %v492_v47, 8  ;;  %v517_v2 = vadd.f32 %v2020_v57, %v305_v55 }
  0xee   : > { %2038 = vmatprep.subr.mxu1 %v2239_v26  ;;  %v511_v61 = vpop.f32.mrf.mxu0 }
  0xef   : > { %v512_v63 = vadd.f32 %v511_v61, %v300_v54 }
  0xf0   : > { %v2023_v1 = vpop.f32.mrf.mxu0 }
  0xf1   : > { %v527_v7 = vadd.f32 %v2023_v1, %v315_v58  ;;  %v255_v1 = vld [vmem:[%s2596_s2 + $0x80] sm:$0xff] }
  0xf2   : > { %v521_v4 = vpop.f32.mrf.mxu0 }
  0xf3   : > { %v522_v5 = vadd.f32 %v521_v4, %v310_v56 }
  0xf4   : > { %v2026_v9 = vpop.f32.mrf.mxu0 }
 0x15b   : > { %v682_v62 = vpop.trf.xlu1 }
 0x15d   : > { %v576_v60 = vpop.trf.xlu0 }
 0x15e   : > { %2036 = vmatmul.mubr.msk.f32.vlgmr.msra.gmra.mxu1 %vm592_vm2, %v576_v60 }
 0x15f   : > { %2039 = vmatpush3.msra.mxu1 %v507_v59  ;;  %2040 = vmatprep.mubr.msk.f32.mxu1 %vm2240_vm1, %v2239_v26 }
 0x160   : > { %2043 = vmatprep.subr.mxu1 %v2239_v26 }
 0x161   : > { %v787_v0 = vpop.trf.xlu0 }
 0x162   : > { %2041 = vmatmul.mubr.msk.f32.vlgmr.msra.gmra.mxu1 %vm592_vm2, %v682_v62 }
 0x163   : > { %2044 = vmatpush3.msra.mxu1 %v512_v63  ;;  %2045 = vmatprep.mubr.msk.f32.mxu1 %vm2240_vm1, %v2239_v26  ;;  %v1102_v8 = vpop.trf.xlu1 }
 0x164   : > { %2048 = vmatprep.subr.mxu1 %v2239_v26 }
 0x165   : > { %v892_v3 = vpop.trf.xlu0 }
 0x166   : > { %2046 = vmatmul.mubr.msk.f32.vlgmr.msra.gmra.mxu1 %vm592_vm2, %v787_v0  ;;  %v256_v0 = vld [vmem:[%s2596_s2 + $0x88] sm:$0xff] }
 0x167   : > { %2049 = vmatpush3.msra.mxu1 %v517_v2  ;;  %2050 = vmatprep.mubr.msk.f32.mxu1 %vm2240_vm1, %v2239_v26 }
 0x168   : > { %2053 = vmatprep.subr.mxu1 %v2239_v26 }
 0x169   : > { %v997_v6 = vpop.trf.xlu0 }
 0x16a   : > { %2051 = vmatmul.mubr.msk.f32.vlgmr.msra.gmra.mxu1 %vm592_vm2, %v892_v3 }
 0x16b   : > { %2054 = vmatpush3.msra.mxu1 %v522_v5  ;;  %2055 = vmatprep.mubr.msk.f32.mxu1 %vm2240_vm1, %v2239_v26 }
 0x16c   : > { %2058 = vmatprep.subr.mxu1 %v2239_v26 }
 0x16e   : > { %2056 = vmatmul.mubr.msk.f32.vlgmr.msra.gmra.mxu1 %vm592_vm2, %v997_v6 }
 0x16f   : > { %2059 = vmatpush3.msra.mxu1 %v527_v7  ;;  %2060 = vmatprep.mubr.msk.f32.mxu1 %vm2240_vm1, %v2239_v26 }
 0x170   : > { %2063 = vmatprep.subr.mxu1 %v2239_v26 }
 0x172   : > { %2061 = vmatmul.mubr.msk.f32.vlgmr.msra.gmra.mxu1 %vm592_vm2, %v1102_v8 }
 0x173   : > { %2065 = vmatprep.mubr.msk.f32.mxu1 %vm2240_vm1, %v2239_v26 }
 0x21e   : > { %v662_v11 = vpop.f32.mrf.mxu1 }
 0x21f   : > { %v1191_v12 = vsel %vm592_vm2, %v662_v11, -inf }
 0x220   : > { %1192 = vmax.xlane.f32.xlu0 %v1191_v12  ;;  %v2037_v13 = vpop.f32.mrf.mxu1  ;;  %v531_v12 = vpop.f32.mrf.mxu0 }
 0x222   : > { %v767_v14 = vpop.f32.mrf.mxu1 }
 0x223   : > { %v1194_v15 = vsel %vm592_vm2, %v767_v14, -inf }
 0x224   : > { %1195 = vmax.xlane.f32.xlu1 %v1194_v15  ;;  %v2042_v16 = vpop.f32.mrf.mxu1 }
 0x226   : > { %v872_v17 = vpop.f32.mrf.mxu1 }
 0x227   : > { %v1197_v18 = vsel %vm592_vm2, %v872_v17, -inf }
 0x228   : > { %1198 = vmax.xlane.f32.xlu1 %v1197_v18  ;;  %v2047_v19 = vpop.f32.mrf.mxu1 }
 0x22a   : > { %v977_v20 = vpop.f32.mrf.mxu1 }
 0x22b   : > { %v1200_v21 = vsel %vm592_vm2, %v977_v20, -inf }
 0x22c   : > { %1201 = vmax.xlane.f32.xlu0 %v1200_v21  ;;  %v2052_v22 = vpop.f32.mrf.mxu1 }
 0x22e   : > { %v1082_v23 = vpop.f32.mrf.mxu1 }
 0x22f   : > { %v1203_v24 = vsel %vm592_vm2, %v1082_v23, -inf }
 0x230   : > { %1204 = vmax.xlane.f32.xlu1 %v1203_v24  ;;  %v2057_v25 = vpop.f32.mrf.mxu1 }
 0x232   : > { %v1187_v27 = vpop.f32.mrf.mxu1 }
 0x233   : > { %v1206_v28 = vsel %vm592_vm2, %v1187_v27, -inf }
 0x234   : > { %1207 = vmax.xlane.f32.xlu0 %v1206_v28  ;;  %v2062_v29 = vpop.f32.mrf.mxu1 }
 0x241   : > { %319 = vperm.xlu1 %2151, %v251_v30  }
 0x245   : > { %329 = vperm.xlu1 %2151, %v253_v31  }
 0x249   : > { %334 = vperm.xlu1 %2151, %v254_v32  }
 0x24a   : > { %324 = vperm.xlu0 %2150, %v252_v33  }
 0x2a9   : > { %v1193_v34 = vpop.xlane.xlu0 %1192 }
 0x2aa   : > { %v1209_v35 = vsub.f32 %v662_v11, %v1193_v34 }
 0x2ac   : > { %v1215_v36 = vmul.f32 1.442695, %v1209_v35 }
 0x2ad   : > { %v1196_v37 = vpop.xlane.xlu1 %1195 }
 0x2ae   : > { %2152 = vpow2.f32 %v1215_v36  ;;  %v1210_v38 = vsub.f32 %v767_v14, %v1196_v37 }
 0x2b0   : > { %v1217_v39 = vmul.f32 1.442695, %v1210_v38 }
 0x2b1   : > { %v1199_v40 = vpop.xlane.xlu1 %1198 }
 0x2b2   : > { %2154 = vpow2.f32 %v1217_v39  ;;  %v1211_v41 = vsub.f32 %v872_v17, %v1199_v40  ;;  %v2029_v17 = vpop.f32.mrf.mxu0  ;;  %v1718_v39 = vld [vmem:[%s2597_s3 + $0x28] sm:$0xff]  ;;  %v1717_v40 = vld [vmem:[%s2597_s3 + $0x20] sm:$0xff] }
 0x2b3   : > { %2094 = vmatpush3.msra.mxu0 %v1718_v39 }
 0x2b4   : > { %v1219_v42 = vmul.f32 1.442695, %v1211_v41  ;;  %v541_v22 = vpop.f32.mrf.mxu0  ;;  %2095 = vmatprep.subr.mxu0 %v2239_v26  ;;  %v1716_v41 = vld [vmem:[%s2597_s3 + $0x18] sm:$0xff] }
 0x2b5   : > { %v1202_v43 = vpop.xlane.xlu0 %1201  ;;  %2096 = vmatpush3.msra.mxu0 %v1717_v40 }
 0x2b6   : > { %2156 = vpow2.f32 %v1219_v42  ;;  %v1212_v44 = vsub.f32 %v977_v20, %v1202_v43  ;;  %v2032_v28 = vpop.f32.mrf.mxu0  ;;  %2097 = vmatprep.subr.mxu0 %v2239_v26  ;;  %v1715_v42 = vld [vmem:[%s2597_s3 + $0x10] sm:$0xff]  ;;  %v1714_v43 = vld [vmem:[%s2597_s3 + $0x8] sm:$0xff] }
 0x2b7   : > { %2098 = vmatpush3.msra.mxu0 %v1716_v41 }
 0x2b8   : > { %v1221_v45 = vmul.f32 1.442695, %v1212_v44  ;;  %v551_v31 = vpop.f32.mrf.mxu0  ;;  %2099 = vmatprep.subr.mxu0 %v2239_v26  ;;  %v1713_v44 = vld [vmem:[%s2597_s3] sm:$0xff] }
 0x2b9   : > { %v1205_v46 = vpop.xlane.xlu1 %1204  ;;  %2100 = vmatpush3.msra.mxu0 %v1715_v42 }
 0x2ba   : > { %2158 = vpow2.f32 %v1221_v45  ;;  %v1213_v47 = vsub.f32 %v1082_v23, %v1205_v46  ;;  %2101 = vmatprep.subr.mxu0 %v2239_v26 }
 0x2bb   : > { %v2153_v48 = vpop.eup %2152  ;;  %2102 = vmatpush3.msra.mxu0 %v1714_v43 }
 0x2bc   : > { %v1223_v49 = vmul.f32 1.442695, %v1213_v47  ;;  %v1227_v50 = vsel %vm592_vm2, %v2153_v48, 0.0  ;;  %2103 = vmatprep.subr.mxu0 %v2239_v26 }
 0x2bd   : > { %1228 = vadd.xlane.f32.xlu1 %v1227_v50  ;;  %v1208_v51 = vpop.xlane.xlu0 %1207  ;;  %v320_v2 = vpop.permute.xlu1 %319  ;;  %2104 = vmatpush3.msra.mxu0 %v1713_v44 }
 0x2be   : > { %2160 = vpow2.f32 %v1223_v49  ;;  %v1214_v52 = vsub.f32 %v1187_v27, %v1208_v51  ;;  %v532_v16 = vadd.f32 %v531_v12, %v320_v2 }
 0x2bf   : > { %v2155_v53 = vpop.eup %2154 }
 0x2c0   : > { %v1225_v54 = vmul.f32 1.442695, %v1214_v52  ;;  %v1230_v55 = vsel %vm592_vm2, %v2155_v53, 0.0 }
 0x2c1   : > { %1231 = vadd.xlane.f32.xlu0 %v1230_v55  ;;  %v330_v3 = vpop.permute.xlu1 %329 }
 0x2c2   : > { %2162 = vpow2.f32 %v1225_v54  ;;  %v542_v25 = vadd.f32 %v541_v22, %v330_v3 }
 0x2c3   : > { %v2157_v56 = vpop.eup %2156 }
 0x2c4   : > { %v1233_v57 = vsel %vm592_vm2, %v2157_v56, 0.0 }
 0x2c5   : > { %1234 = vadd.xlane.f32.xlu1 %v1233_v57  ;;  %v335_v4 = vpop.permute.xlu1 %334  ;;  %v325_v5 = vpop.permute.xlu0 %324  ;;  %v1948_v57 = vld [vmem:[%s2598_s4] ss:$0 sm:$0xff] }
 0x2c6   : > { %v537_v21 = vadd.f32 %v2026_v9, %v325_v5  ;;  %v547_v30 = vadd.f32 %v2029_v17, %v335_v4 }
 0x2c7   : > { %v2159_v58 = vpop.eup %2158 }
 0x2c8   : > { %v1236_v59 = vsel %vm592_vm2, %v2159_v58, 0.0 }
 0x2c9   : > { %1237 = vadd.xlane.f32.xlu0 %v1236_v59 }
 0x2cb   : > { %v2161_v60 = vpop.eup %2160 }
 0x2cc   : > { %v1239_v61 = vsel %vm592_vm2, %v2161_v60, 0.0 }
 0x2cd   : > { %1240 = vadd.xlane.f32.xlu1 %v1239_v61 }
 0x2cf   : > { %v2488_v62 = vpop.eup %2162 }
 0x2d0   : > { %v1242_v63 = vsel %vm592_vm2, %v2488_v62, 0.0 }
 0x2d1   : > { %1243 = vadd.xlane.f32.xlu0 %v1242_v63 }
 0x2de   : > { %344 = vperm.xlu1 %2151, %v256_v0  }
 0x2e7   : > { %339 = vperm.xlu0 %2150, %v255_v1  }
 0x346   : > { %v1229_v6 = vpop.xlane.xlu1 %1228 }
 0x347   : > { %2164 = vrcp.f32 %v1229_v6 }
 0x34a   : > { %v1232_v7 = vpop.xlane.xlu0 %1231 }
 0x34b   : > { %2166 = vrcp.f32 %v1232_v7 }
 0x34e   : > { %v1235_v8 = vpop.xlane.xlu1 %1234 }
 0x34f   : > { %2168 = vrcp.f32 %v1235_v8 }
 0x352   : > { %v1238_v10 = vpop.xlane.xlu0 %1237 }
 0x353   : > { %2170 = vrcp.f32 %v1238_v10 }
 0x354   : > { %v2165_v11 = vpop.eup %2164 }
 0x355   : > { %v1251_v13 = vmul.f32 %v2165_v11, %v2153_v48 }
 0x356   : > { %v1241_v14 = vpop.xlane.xlu1 %1240 }
 0x357   : > { %2172 = vrcp.f32 %v1241_v14  ;;  %2064 = vmatpush3.xpose.msk.msra.mxu1 %vm592_vm2, %v1251_v13 }
 0x358   : > { %v2167_v15 = vpop.eup %2166  ;;  %2068 = vmatprep.subr.mxu1 %v2239_v26 }
 0x359   : > { %v1252_v18 = vmul.f32 %v2167_v15, %v2155_v53 }
 0x35a   : > { %2066 = vmatmul.mubr.msk.f32.vlgmr.msra.gmra.mxu1 %vm592_vm2, %v532_v16  ;;  %v1244_v19 = vpop.xlane.xlu0 %1243  ;;  %v345_v36 = vpop.permute.xlu1 %344 }
 0x35b   : > { %2174 = vrcp.f32 %v1244_v19  ;;  %2069 = vmatpush3.xpose.msk.msra.mxu1 %vm592_vm2, %v1252_v18  ;;  %2070 = vmatprep.mubr.msk.f32.mxu1 %vm2240_vm1, %v2239_v26  ;;  %v557_v38 = vadd.f32 %v2032_v28, %v345_v36 }
 0x35c   : > { %v2169_v20 = vpop.eup %2168  ;;  %2073 = vmatprep.subr.mxu1 %v2239_v26 }
 0x35d   : > { %v1253_v23 = vmul.f32 %v2169_v20, %v2157_v56 }
 0x35e   : > { %2071 = vmatmul.mubr.msk.f32.vlgmr.msra.gmra.mxu1 %vm592_vm2, %v537_v21 }
 0x35f   : > { %2074 = vmatpush3.xpose.msk.msra.mxu1 %vm592_vm2, %v1253_v23  ;;  %2075 = vmatprep.mubr.msk.f32.mxu1 %vm2240_vm1, %v2239_v26 }
 0x360   : > { %v2171_v24 = vpop.eup %2170  ;;  %2078 = vmatprep.subr.mxu1 %v2239_v26 }
 0x361   : > { %v1254_v27 = vmul.f32 %v2171_v24, %v2159_v58 }
 0x362   : > { %2076 = vmatmul.mubr.msk.f32.vlgmr.msra.gmra.mxu1 %vm592_vm2, %v542_v25  ;;  %v340_v32 = vpop.permute.xlu0 %339 }
 0x363   : > { %2079 = vmatpush3.xpose.msk.msra.mxu1 %vm592_vm2, %v1254_v27  ;;  %2080 = vmatprep.mubr.msk.f32.mxu1 %vm2240_vm1, %v2239_v26  ;;  %v552_v35 = vadd.f32 %v551_v31, %v340_v32 }
 0x364   : > { %v2173_v29 = vpop.eup %2172  ;;  %2083 = vmatprep.subr.mxu1 %v2239_v26 }
 0x365   : > { %v1255_v33 = vmul.f32 %v2173_v29, %v2161_v60 }
 0x366   : > { %2081 = vmatmul.mubr.msk.f32.vlgmr.msra.gmra.mxu1 %vm592_vm2, %v547_v30 }
 0x367   : > { %2084 = vmatpush3.xpose.msk.msra.mxu1 %vm592_vm2, %v1255_v33  ;;  %2085 = vmatprep.mubr.msk.f32.mxu1 %vm2240_vm1, %v2239_v26 }
 0x368   : > { %v2175_v34 = vpop.eup %2174  ;;  %2088 = vmatprep.subr.mxu1 %v2239_v26 }
 0x369   : > { %v1256_v37 = vmul.f32 %v2175_v34, %v2488_v62 }
 0x36a   : > { %2086 = vmatmul.mubr.msk.f32.vlgmr.msra.gmra.mxu1 %vm592_vm2, %v552_v35 }
 0x36b   : > { %2089 = vmatpush3.xpose.msk.msra.mxu1 %vm592_vm2, %v1256_v37  ;;  %2090 = vmatprep.mubr.msk.f32.mxu1 %vm2240_vm1, %v2239_v26 }
 0x36e   : > { %2091 = vmatmul.mubr.msk.f32.vlgmr.msra.gmra.mxu1 %vm592_vm2, %v557_v38 }
 0x41a   : > { %v1329_v45 = vpop.f32.mrf.mxu1 }
 0x41b   : > { %1726 = vxpose.xlu0.b32.start [1/6] (short) (narrow) %v1329_v45, 8 }
 0x41c   : > { %v2067_v46 = vpop.f32.mrf.mxu1 }
 0x41e   : > { %v1405_v47 = vpop.f32.mrf.mxu1 }
 0x41f   : > { %1727 = vxpose.xlu0.b32.cont [2/6] (short) (narrow) %v1405_v47, 8 }
 0x420   : > { %v2072_v48 = vpop.f32.mrf.mxu1 }
 0x422   : > { %v1481_v49 = vpop.f32.mrf.mxu1 }
 0x423   : > { %1728 = vxpose.xlu0.b32.cont [3/6] (short) (narrow) %v1481_v49, 8 }
 0x424   : > { %v2077_v50 = vpop.f32.mrf.mxu1 }
 0x426   : > { %v1557_v51 = vpop.f32.mrf.mxu1 }
 0x427   : > { %1729 = vxpose.xlu0.b32.cont [4/6] (short) (narrow) %v1557_v51, 8 }
 0x428   : > { %v2082_v52 = vpop.f32.mrf.mxu1 }
 0x42a   : > { %v1633_v53 = vpop.f32.mrf.mxu1 }
 0x42b   : > { %1730 = vxpose.xlu0.b32.cont [5/6] (short) (narrow) %v1633_v53, 8 }
 0x42c   : > { %v2087_v54 = vpop.f32.mrf.mxu1 }
 0x42e   : > { %v1709_v55 = vpop.f32.mrf.mxu1 }
 0x42f   : > { %1731 = vxpose.xlu0.b32.end [6/6] (short) (narrow) %v1709_v55, 8 }
 0x430   : > { %v2092_v26 = vpop.f32.mrf.mxu1 }
 0x497   : > { %v1742_v56 = vpop.trf.xlu0 }
 0x498   : > { %2106 = vmatmul.mubr.msk.f32.vlgmr.msra.gmra.mxu0 %vm347_vm0, %v1742_v56 }
 0x558   : > { %v1827_v58 = vpop.f32.mrf.mxu0 }
 0x559   : > { %v1828_v59 = vadd.f32 %v1948_v57, %v1827_v58 }
 0x55a   : > { %v2107_v60 = vpop.f32.mrf.mxu0 }
 0x55b   : > { %1831 = vst.msk [vmem:[%s215_s25] sm:$0xff] %vm347_vm0, %v1828_v59 }
 0x55c   : > { %2189 = shalt.err (!%p2186_p3)
}
 0x55d   : > { %s2190_s12 = scalar_lea.hbm %s2558_s7, 128  ;;  %s2194_s15 = scalar_lea.hbm %s2599_s5, 256 }
 0x55e   : > { %p2191_p4 = scmp.ne.s32.totalorder %s2558_s7, %s2190_s12  ;;  %p2195_p9 = scmp.lt.s32.totalorder %s2558_s7, %s2599_s5 }
 0x55f   : > { %p2196_p10 = scmp.lt.s32.totalorder %s2194_s15, %s2190_s12 }
 0x560   : > { %p2192_p7 = pnand %p2191_p4, %p2310_p5 }
 0x561   : > { %p2197_p11 = por %p2196_p10, %p2195_p9 }
 0x562   : > { %p2193_p8 = pneg %p2192_p7 }
 0x564   : > { %p2198_p12 = pnand %p2197_p11, %p2193_p8 }
 0x566   : > { %2201 = shalt.err (!%p2198_p12)
}
 0x567   : > { %2108 = dma.vmem_to_hbm [thread:$0]  (%p2310_p5), %s1847_s26, 128, %s2558_s7, %s1833_s8  }
 0x568 PF: > { %p2114_p13 = scmp.ge.s32.totalorder %s2236_s21, 2  ;;  %s1858_s23 = sand.u32 1, %s2224_s18  }
 0x569   : > { %s1859_s25 = scalar_lea.sflag [#allocation3], %s1858_s23 }
 0x56a   : > { %p2111_p0 = pnand %p2114_p13, %p2314_p6 }
 0x56c   : > { %p2112_p1 = pneg %p2111_p0 }
 0x56e   : > { %2219 = dma.done.wait (%p2112_p1), %s1859_s25, 128  }
 0x56f   : > { %2221 = vsyncadd (%p2112_p1), %s1859_s25, 4294967168  ;;  %p15_p2 = scmp.ge.s32.totalorder %s2297_s24, 4   ;;  %s2602_s18 = smov %s2228_s19 }
 0x570   : > { %s2603_s19 = smov %s2232_s20  ;;  %s2604_s20 = smov %s2308_s27 }
 0x571   : > { %s2605_s21 = smov %s2297_s24  ;;  %17 = sbr.rel (!%p15_p2) target bundleno = 3 (0x3), region = 75 }
 0x576   :  { %1864 = vsyncpa [#allocation3], 1 }
 0x577   :  { %1866 = vsyncpa [#allocation3 + $0x1], 1 }

</bundles_post_ra>
